<compile_context>
chip_gen: v7x
topology: tpu7x:2x2x1
jax: 0.10.0
libtpu: 0.0.40
codegen_flags: <defaults>
</compile_context>

<pallas_src>
import functools

import numpy as np
import jax
import jax.numpy as jnp
from jax.experimental import pallas as pl
from jax.experimental.pallas import tpu as pltpu


def _round_up(v, m):
    return ((v + m - 1) // m) * m


_TK_CANDIDATES = (4096, 2048, 1024, 512, 256, 128)


def _plan_k(K, max_tk):
    """Return (tk, K_pad): K padded to a 128-multiple, largest tk dividing it."""
    K_pad = _round_up(K, 128)
    for c in _TK_CANDIDATES:
        if c <= max_tk and K_pad % c == 0:
            return c, K_pad
    return 128, K_pad


def _plan_prefill_n(N):
    """Lane-dense output tile for the dense (prefill) GEMM."""
    # 384 intentionally excluded: half-occupied pass on the 256-wide v6e/v7x MXU.
    for c in (1024, 512, 256, 128):
        if N % c == 0:
            return c, N
    if N < 256:
        return 128, _round_up(N, 128)
    N_pad = _round_up(N, 256)              # pad to a 256 multiple instead of 384
    return (512 if N_pad % 512 == 0 else 256), N_pad


def _plan_decode_n(N):
    """Decode GEMV: minimal padding; keep j-extent >= 2 when possible (v7x 2 TCs)."""
    N_pad = _round_up(N, 128)
    for c in (1024, 512, 256, 128):
        if N_pad % c == 0 and N_pad // c >= 2:
            return c, N_pad
    for c in (1024, 512, 256, 128):
        if N_pad % c == 0:
            return c, N_pad
    return 128, N_pad


def _plan_prefill(K, N):
    tn, N_pad = _plan_prefill_n(N)
    tk, K_pad = _plan_k(K, max_tk=2048)
    return tk, K_pad, tn, N_pad


def _plan_decode(K, N):
    tn, N_pad = _plan_decode_n(N)
    # Target ~4 MiB weight DMA per streaming step: tk * tn * 2B <= 4 MiB.
    max_tk = max(128, min(4096, (1 << 21) // tn))
    tk, K_pad = _plan_k(K, max_tk=max_tk)
    return tk, K_pad, tn, N_pad


def _pad_2d(a, rows, cols):
    r, c = a.shape
    if r == rows and c == cols:
        return a
    return jnp.pad(a, ((0, rows - r), (0, cols - c)))


def _matmul_bias_kernel(x_ref, w_ref, b_ref, o_ref, acc_ref):
    """o = x @ w + b, tiled over an (M, N, K) grid, K (reduction) innermost."""
    k = pl.program_id(2)

    @pl.when(k == 0)
    def _():
        acc_ref[...] = jnp.zeros_like(acc_ref)

    # x tile (tm, tk) @ w tile (tk, tn) -> (tm, tn) partial product.
    # Weight is pre-transposed in HBM, so there is no in-kernel transpose.
    acc_ref[...] += jnp.dot(
        x_ref[...], w_ref[...], preferred_element_type=jnp.float32
    )

    @pl.when(k == pl.num_programs(2) - 1)
    def _():
        # Single fused add + cast + wide lane-dense store epilogue.
        o_ref[...] = (acc_ref[...] + b_ref[...].astype(jnp.float32)).astype(
            o_ref.dtype
        )


@functools.partial(jax.jit, static_argnames=("tm", "tk", "tn", "n_out"))
def _pallas_linear_padded(x, wt_p, b_p, *, tm, tk, tn, n_out):
    """y = (x @ wt_p + b_p)[:M, :n_out].

    x:    (M, K)        bf16 activations (padded in-jit; cheap).
    wt_p: (K_pad, N_pad) bf16 pre-transposed, pre-padded weight (no in-jit pad).
    b_p:  (1, N_pad)     bf16 pre-padded bias.
    """
    M, K = x.shape
    K_pad, N_pad = wt_p.shape
    assert K_pad % tk == 0 and N_pad % tn == 0, (K_pad, tk, N_pad, tn)

    M_pad = _round_up(M, tm)
    if M_pad != M or K_pad != K:
        # Only the (small) activation is padded per call; zero rows/cols
        # contribute nothing to the accumulation and are sliced off below.
        x = jnp.pad(x, ((0, M_pad - M), (0, K_pad - K)))

    grid = (M_pad // tm, N_pad // tn, K_pad // tk)

    # Decode (tiny M) is pure weight streaming: triple-buffer the weight tile
    # when the streaming loop is long enough for deeper buffering to hide DMA.
    n_w_steps = (N_pad // tn) * (K_pad // tk)
    if M_pad <= 16 and n_w_steps >= 4:
        w_spec = pl.BlockSpec((tk, tn), lambda i, j, k: (k, j),
                              pipeline_mode=pl.Buffered(3))
    else:
        w_spec = pl.BlockSpec((tk, tn), lambda i, j, k: (k, j))

    out = pl.pallas_call(
        _matmul_bias_kernel,
        out_shape=jax.ShapeDtypeStruct((M_pad, N_pad), jnp.bfloat16),
        grid_spec=pltpu.PrefetchScalarGridSpec(
            num_scalar_prefetch=0,
            grid=grid,
            in_specs=[
                pl.BlockSpec((tm, tk), lambda i, j, k: (i, k)),   # x
                w_spec,                                            # weight (K, N)
                pl.BlockSpec((1, tn), lambda i, j, k: (0, j)),     # bias
            ],
            out_specs=pl.BlockSpec((tm, tn), lambda i, j, k: (i, j)),
            scratch_shapes=[pltpu.VMEM((tm, tn), jnp.float32)],
        ),
        compiler_params=pltpu.CompilerParams(
            # i/j independent -> megacore / 2-TC sharding; K is the reduction.
            dimension_semantics=("parallel", "parallel", "arbitrary"),
            # Large tiles (up to ~24 MiB live) exceed the 16 MiB default scoped
            # VMEM on v5e; raise explicitly, still well under physical VMEM.
            vmem_limit_bytes=48 * 1024 * 1024,
        ),
    )(x, wt_p, b_p)

    return out[:M, :n_out]


class ReduceLayerFC2:
    """JAX/Pallas port of ReduceLayer_fc2.

    Weights are kept pre-transposed ((in_features, out_features)) in bf16 and
    pre-padded to tile-aligned shapes once, so every call feeds the MXU
    directly with no per-call weight copy / transpose.
    """

    def __init__(self, weight, bias, sparsity, memory_limit):
        # weight: (out_features, in_features), bias: (out_features,)
        self.out_features, self.in_features = weight.shape
        self.memory_limit = memory_limit
        self.remained_neurons = int(self.in_features * sparsity)

        # ---- prefill (dense) plan: pad ONCE at init, never inside the jit ----
        self._pf_tk, self._pf_kpad, self._pf_tn, self._pf_npad = _plan_prefill(
            self.in_features, self.out_features)
        wt = jnp.asarray(weight, jnp.bfloat16).T          # (in, out) in HBM
        self.weight_t = _pad_2d(wt, self._pf_kpad, self._pf_npad)
        b = jnp.asarray(bias, jnp.bfloat16).reshape(1, -1)
        self._bias_pf = _pad_2d(b, 1, self._pf_npad)

        # ---- decode (reduced) plan: filtered weight stored ALREADY padded ----
        self._dc_tk, self._dc_kpad, self._dc_tn, self._dc_npad = _plan_decode(
            self.remained_neurons, self.out_features)
        # Zero-init matches the original module (decode before prefill -> bias only).
        self.filtered_Wt = jnp.zeros((self._dc_kpad, self._dc_npad), jnp.bfloat16)
        self._bias_dc = _pad_2d(b, 1, self._dc_npad)

        self._cached_indices = None
        # TODO(synk): the memory_limit-driven .cpu()/.cuda() weight shuffling has
        # no Pallas equivalent; weights stay resident in HBM.

    def _update_filtered(self, indices_list):
        idx = np.asarray(jax.device_get(indices_list)).astype(np.int32)
        # Gather only when the sparsity pattern actually changes.
        if self._cached_indices is not None and np.array_equal(idx, self._cached_indices):
            return
        self._cached_indices = idx
        # Row gather from the pre-transposed weight (== W[:, indices].T), then
        # pad once to the decode tile plan so decode never pads in-jit.
        gathered = self.weight_t[jnp.asarray(idx), :self.out_features]
        self.filtered_Wt = _pad_2d(gathered, self._dc_kpad, self._dc_npad)

    def __call__(self, x, indices_list=None):
        x = x.astype(jnp.bfloat16)
        if x.shape[0] > 1:
            # Prefill: dense y = x @ W.T + b on the MXU.
            M = x.shape[0]
            # Single M tile up to 1024 tokens (one weight pass); tm=512 beyond.
            tm = _round_up(M, 16) if M <= 1024 else 512
            y = _pallas_linear_padded(
                x, self.weight_t, self._bias_pf,
                tm=tm, tk=self._pf_tk, tn=self._pf_tn, n_out=self.out_features)
            if indices_list is not None:
                self._update_filtered(indices_list)
            return y
        # Decode: reduced-width GEMV with the pre-padded filtered weight.
        return _pallas_linear_padded(
            x, self.filtered_Wt, self._bias_dc,
            tm=16, tk=self._dc_tk, tn=self._dc_tn, n_out=self.out_features)


if __name__ == "__main__":
    key = jax.random.PRNGKey(0)
    ks = jax.random.split(key, 8)

    def ref_linear(x, wt, b):
        return (x.astype(jnp.float32) @ wt.astype(jnp.float32)
                + b.astype(jnp.float32))

    # ---------------- small config (fc2: ffn=128 -> hidden=64) ----------------
    in_f, out_f, tokens, sparsity = 128, 64, 8, 0.5
    weight = jax.random.normal(ks[0], (out_f, in_f), jnp.float32) * 0.05
    bias = jax.random.normal(ks[1], (out_f,), jnp.float32) * 0.05
    layer = ReduceLayerFC2(weight, bias, sparsity, memory_limit=True)
    idx = jnp.arange(0, in_f, 2, dtype=jnp.int32)          # kept neurons

    wt_ref = jnp.asarray(weight, jnp.bfloat16).T
    b_ref = jnp.asarray(bias, jnp.bfloat16)

    # prefill path (x.size(0) > 1)
    x = (jax.random.normal(ks[2], (tokens, in_f), jnp.float32) * 0.1
         ).astype(jnp.bfloat16)
    y = jax.block_until_ready(layer(x, idx))
    y_ref = ref_linear(x, wt_ref, b_ref)
    assert y.shape == (tokens, out_f) and y.dtype == jnp.bfloat16
    assert jnp.allclose(y.astype(jnp.float32), y_ref, atol=2e-2, rtol=2e-2)

    # decode path (x.size(0) == 1) uses filtered_W
    x1 = (jax.random.normal(ks[3], (1, layer.remained_neurons), jnp.float32) * 0.1
          ).astype(jnp.bfloat16)
    y1 = jax.block_until_ready(layer(x1))
    y1_ref = ref_linear(x1, wt_ref[idx, :], b_ref)
    assert y1.shape == (1, out_f) and y1.dtype == jnp.bfloat16
    assert jnp.allclose(y1.astype(jnp.float32), y1_ref, atol=2e-2, rtol=2e-2)

    # ------ medium config: exercises M/N/K zero-padding (non-multiple dims) ----
    in_f2, out_f2, tokens2, sparsity2 = 1000, 320, 100, 0.5
    weight2 = jax.random.normal(ks[4], (out_f2, in_f2), jnp.float32) * 0.02
    bias2 = jax.random.normal(ks[5], (out_f2,), jnp.float32) * 0.02
    layer2 = ReduceLayerFC2(weight2, bias2, sparsity2, memory_limit=False)
    idx2 = jnp.arange(0, in_f2, 2, dtype=jnp.int32)

    wt2_ref = jnp.asarray(weight2, jnp.bfloat16).T
    b2_ref = jnp.asarray(bias2, jnp.bfloat16)

    x2 = (jax.random.normal(ks[6], (tokens2, in_f2), jnp.float32) * 0.1
          ).astype(jnp.bfloat16)
    y2 = jax.block_until_ready(layer2(x2, idx2))
    y2_ref = ref_linear(x2, wt2_ref, b2_ref)
    assert y2.shape == (tokens2, out_f2) and y2.dtype == jnp.bfloat16
    assert jnp.allclose(y2.astype(jnp.float32), y2_ref, atol=5e-2, rtol=5e-2)

    # second prefill with identical indices -> gather is skipped (cached)
    y2b = jax.block_until_ready(layer2(x2, idx2))
    assert jnp.allclose(y2b.astype(jnp.float32), y2_ref, atol=5e-2, rtol=5e-2)

    x3 = (jax.random.normal(ks[7], (1, layer2.remained_neurons), jnp.float32) * 0.1
          ).astype(jnp.bfloat16)
    y3 = jax.block_until_ready(layer2(x3))
    y3_ref = ref_linear(x3, wt2_ref[idx2, :], b2_ref)
    assert y3.shape == (1, out_f2) and y3.dtype == jnp.bfloat16
    assert jnp.allclose(y3.astype(jnp.float32), y3_ref, atol=5e-2, rtol=5e-2)

    print("KERNEL_OK")
</pallas_src>

<mosaic_0001>
module attributes {stable_mosaic.version = 11 : i64} {
  func.func @_matmul_bias_kernel(%arg0: i32, %arg1: i32, %arg2: i32, %arg3: memref<16x128xbf16, #tpu.memory_space<vmem>>, %arg4: memref<128x128xbf16, #tpu.memory_space<vmem>>, %arg5: memref<1x128xbf16, #tpu.memory_space<vmem>>, %arg6: memref<16x128xbf16, #tpu.memory_space<vmem>>, %arg7: memref<16x128xf32, #tpu.memory_space<vmem>>) attributes {dimension_semantics = [#tpu.dimension_semantics<parallel>, #tpu.dimension_semantics<parallel>, #tpu.dimension_semantics<arbitrary>], iteration_bounds = array<i64: 1, 1, 1>, scalar_prefetch = 0 : i64, scratch_operands = 1 : i64, tpu.core_type = #tpu.core_type<tc>, window_params = [{transform_indices = @transform_0, window_bounds = array<i64: 16, 128>}, {transform_indices = @transform_1, window_bounds = array<i64: 128, 128>}, {transform_indices = @transform_2, window_bounds = array<i64: 1, 128>}, {transform_indices = @transform_3, window_bounds = array<i64: 16, 128>}]} {
    %c0_i32 = arith.constant 0 : i32
    %0 = arith.cmpi eq, %arg2, %c0_i32 : i32
    %1 = arith.extui %0 : i1 to i32
    %c0_i32_0 = arith.constant 0 : i32
    %2 = arith.cmpi ne, %1, %c0_i32_0 : i32
    scf.if %2 {
      %cst_10 = arith.constant 0.000000e+00 : f32
      %12 = vector.broadcast %cst_10 : f32 to vector<16x128xf32>
      %c0_11 = arith.constant 0 : index
      %c0_12 = arith.constant 0 : index
      %13 = vector.load %arg7[%c0_11, %c0_12] : memref<16x128xf32, #tpu.memory_space<vmem>>, vector<16x128xf32>
      tpu.vector_store %arg7[%c0_11, %c0_12], %12 {strides = array<i32>} : memref<16x128xf32, #tpu.memory_space<vmem>>, vector<16x128xf32>,
    } else {
    }
    %c0 = arith.constant 0 : index
    %c0_1 = arith.constant 0 : index
    %3 = vector.load %arg7[%c0, %c0_1] : memref<16x128xf32, #tpu.memory_space<vmem>>, vector<16x128xf32>
    %c0_2 = arith.constant 0 : index
    %c0_3 = arith.constant 0 : index
    %4 = vector.load %arg3[%c0_2, %c0_3] : memref<16x128xbf16, #tpu.memory_space<vmem>>, vector<16x128xbf16>
    %c0_4 = arith.constant 0 : index
    %c0_5 = arith.constant 0 : index
    %5 = vector.load %arg4[%c0_4, %c0_5] : memref<128x128xbf16, #tpu.memory_space<vmem>>, vector<128x128xbf16>
    %cst = arith.constant dense<0.000000e+00> : vector<16x128xf32>
    %6 = tpu.matmul %4, %5, %cst {dimension_numbers = #tpu.dot_dimension_numbers<[1], [0], [0], [1], [0, 0, 1, 1], [], []>} : vector<16x128xbf16>, vector<128x128xbf16>, vector<16x128xf32> -> vector<16x128xf32>
    %7 = arith.addf %3, %6 : vector<16x128xf32>
    %c0_6 = arith.constant 0 : index
    %c0_7 = arith.constant 0 : index
    %8 = vector.load %arg7[%c0_6, %c0_7] : memref<16x128xf32, #tpu.memory_space<vmem>>, vector<16x128xf32>
    tpu.vector_store %arg7[%c0_6, %c0_7], %7 {strides = array<i32>} : memref<16x128xf32, #tpu.memory_space<vmem>>, vector<16x128xf32>,
    %c0_i32_8 = arith.constant 0 : i32
    %9 = arith.cmpi eq, %arg2, %c0_i32_8 : i32
    %10 = arith.extui %9 : i1 to i32
    %c0_i32_9 = arith.constant 0 : i32
    %11 = arith.cmpi ne, %10, %c0_i32_9 : i32
    scf.if %11 {
      %c0_10 = arith.constant 0 : index
      %c0_11 = arith.constant 0 : index
      %12 = vector.load %arg7[%c0_10, %c0_11] : memref<16x128xf32, #tpu.memory_space<vmem>>, vector<16x128xf32>
      %c0_12 = arith.constant 0 : index
      %c0_13 = arith.constant 0 : index
      %13 = vector.load %arg5[%c0_12, %c0_13] : memref<1x128xbf16, #tpu.memory_space<vmem>>, vector<1x128xbf16>
      %14 = arith.extf %13 : vector<1x128xbf16> to vector<1x128xf32>
      %15 = vector.broadcast %14 : vector<1x128xf32> to vector<16x128xf32>
      %16 = arith.addf %12, %15 : vector<16x128xf32>
      %17 = arith.truncf %16 : vector<16x128xf32> to vector<16x128xbf16>
      %c0_14 = arith.constant 0 : index
      %c0_15 = arith.constant 0 : index
      %18 = vector.load %arg6[%c0_14, %c0_15] : memref<16x128xbf16, #tpu.memory_space<vmem>>, vector<16x128xbf16>
      tpu.vector_store %arg6[%c0_14, %c0_15], %17 {strides = array<i32>} : memref<16x128xbf16, #tpu.memory_space<vmem>>, vector<16x128xbf16>,
    } else {
    }
    return
  }
  func.func @transform_0(%arg0: i32, %arg1: i32, %arg2: i32) -> (i32, i32) {
    %c0_i32 = arith.constant 0 : i32
    return %arg0, %arg2 : i32, i32
  }
  func.func @transform_1(%arg0: i32, %arg1: i32, %arg2: i32) -> (i32, i32) {
    %c0_i32 = arith.constant 0 : i32
    return %arg2, %arg1 : i32, i32
  }
  func.func @transform_2(%arg0: i32, %arg1: i32, %arg2: i32) -> (i32, i32) {
    %c0_i32 = arith.constant 0 : i32
    %c0_i32_0 = arith.constant 0 : i32
    return %c0_i32, %arg1 : i32, i32
  }
  func.func @transform_3(%arg0: i32, %arg1: i32, %arg2: i32) -> (i32, i32) {
    %c0_i32 = arith.constant 0 : i32
    return %arg0, %arg1 : i32, i32
  }
}

</mosaic_0001>

<bundles_post_ra>
// kernel: _pallas_linear_padded.1
= control target key start
LH: loop header
LB: loop body
LE: loop exit
PB: predicated region body
PF: predicated region fallthrough
CT: control target
= control target key end

     0   :  { %8 = vsyncpa [#allocation4], 0  ;;  %s267_s12 = smov [#allocation3]   ;;  %s313_s0 = inlined_call_operand.vmem [shape: bf16[16,128], index: 0, kind: input, shape index: {}]   ;;  %s314_s1 = inlined_call_operand.hbm [shape: bf16[128,128], index: 1, kind: input, shape index: {}]   ;;  %s315_s2 = inlined_call_operand.vmem [shape: bf16[1,128], index: 2, kind: input, shape index: {}]   ;;  %s316_s3 = inlined_call_operand.vmem [shape: bf16[16,128], index: 3, kind: output, shape index: {}]  }
   0x1   :  { %s16_s13 = sshll.u32 %s267_s12, 4  ;;  %s243_s16 = scalar_lea.hbm %s314_s1, 1024  ;;  %s17_s13 = int_to_ptr.vmem [resolvable:$true] %s16_s13 }
   0x2   :  { %p244_p0 = scmp.ne.s32.totalorder %s314_s1, %s243_s16  ;;  %p247_p1 = scmp.lt.u32.totalorder %s243_s16, %s314_s1 }
   0x4   :  { %p249_p2 = pnand %p247_p1, %p244_p0 }
   0x6   :  { %252 = shalt.err (!%p249_p2)
}
   0x7   :  { %s253_s21 = scalar_lea.vmem %s17_s13, 1024  ;;  %p258_p4 = scmp.lt.s32.totalorder %s17_s13, %s17_s13 }
   0x8   :  { %p254_p3 = scmp.ne.s32.totalorder %s17_s13, %s253_s21  ;;  %p259_p5 = scmp.lt.s32.totalorder %s253_s21, %s253_s21 }
   0xa   :  { %p260_p6 = por %p259_p5, %p258_p4 }
   0xc   :  { %p261_p7 = pnand %p260_p6, %p254_p3 }
   0xe   :  { %264 = shalt.err (!%p261_p7)
}
   0xf   :  { %s268_s22 = smov 64   ;;  %s269_s23 = smov 4  }
  0x10   :  { %22 = dma.hbm_to_vmem [thread:$0]  %s314_s1, 1024, %s17_s13, [#allocation4], %s268_s22, %s268_s22, %s269_s23  }
  0x11   :  { %265 = dma.done.wait [#allocation4], 1024  }
  0x12   :  { %266 = vsyncadd [#allocation4], 4294966272  ;;  %v270_v0 = vmov 0.0   ;;  %vm271_vm0 = vmmov 0   ;;  %v234_v1 = vld [vmem:[#allocation3] sm:$0xff]   ;;  %v235_v2 = vld [vmem:[#allocation3 + $0x8] sm:$0xff]   ;;  %v161_v10 = vlaneseq }
  0x13   :  { %209 = vmatprep.subr.bf16.mxu0 %v270_v0  ;;  %225 = vmatprep.mubr.msk.bf16.mxu0 %vm271_vm0, %v270_v0  ;;  %v236_v3 = vld [vmem:[#allocation3 + $0x10] sm:$0xff]   ;;  %v237_v4 = vld [vmem:[#allocation3 + $0x18] sm:$0xff]   ;;  %v238_v5 = vld [vmem:[#allocation3 + $0x20] sm:$0xff]  }
  0x14   :  { %210 = vmatpush3.bf16.msra.mxu0 %v234_v1  ;;  %v239_v6 = vld [vmem:[#allocation3 + $0x28] sm:$0xff]   ;;  %v240_v7 = vld [vmem:[#allocation3 + $0x30] sm:$0xff]   ;;  %v241_v8 = vld [vmem:[#allocation3 + $0x38] sm:$0xff]   ;;  %v162_v11 = vshrl.u32 %v161_v10, 7 }
  0x15   :  { %211 = vmatprep.subr.bf16.mxu0 %v270_v0  ;;  %v242_v9 = vld [vmem:[%s313_s0] sm:$0xff]  }
  0x16   :  { %v159_v12 = vld [vmem:[%s315_s2] sm:$0x1]  ;;  %v163_v14 = vsub.s32 0, %v162_v11 }
  0x17   :  { %v160_v13 = vunpack.c.l.bf16 %v159_v12 }
  0x18   :  { %212 = vmatpush3.bf16.msra.mxu0 %v235_v2 }
  0x19   :  { %213 = vmatprep.subr.bf16.mxu0 %v270_v0  ;;  %v164_v15 = vrot.slane %v160_v13, %v163_v14 }
  0x1c   :  { %214 = vmatpush3.bf16.msra.mxu0 %v236_v3 }
  0x1d   :  { %215 = vmatprep.subr.bf16.mxu0 %v270_v0 }
  0x20   :  { %216 = vmatpush3.bf16.msra.mxu0 %v237_v4 }
  0x21   :  { %217 = vmatprep.subr.bf16.mxu0 %v270_v0 }
  0x24   :  { %218 = vmatpush3.bf16.msra.mxu0 %v238_v5 }
  0x25   :  { %219 = vmatprep.subr.bf16.mxu0 %v270_v0 }
  0x28   :  { %220 = vmatpush3.bf16.msra.mxu0 %v239_v6 }
  0x29   :  { %221 = vmatprep.subr.bf16.mxu0 %v270_v0 }
  0x2c   :  { %222 = vmatpush3.bf16.msra.mxu0 %v240_v7 }
  0x2d   :  { %223 = vmatprep.subr.bf16.mxu0 %v270_v0 }
  0x30   :  { %224 = vmatpush3.bf16.msra.mxu0 %v241_v8 }
  0x33   :  { %226 = vmatmul.mubr.bf16.vlgmr.msra.gmra.mrb[0].mxu0 %v242_v9 }
 0x106   :  { %v143_v16 = vpop.f32.mrb[0].mxu0 }
 0x107   :  { %v227_v17 = vpop.f32.mrb[1].mxu0  ;;  %v165_v19 = vadd.f32 %v164_v15, %v143_v16 }
 0x108   :  { %v146_v18 = vpop.f32.mrb[2].mxu0 }
 0x109   :  { %v166_v20 = vadd.f32 %v164_v15, %v146_v18  ;;  %v228_v21 = vpop.f32.mrb[3].mxu0 }
 0x10b   :  { %v198_v22 = vpack.c.bf16 %v166_v20, %v165_v19 }
 0x10d   :  { %199 = vst [vmem:[%s316_s3] sm:$0xff] %v198_v22  }
 0x10e   :  { %181 = vsyncpa [#allocation4], 1 }

</bundles_post_ra>
